<compile_context>
chip_gen: v5e
topology: v5e:2x2
jax: 0.10.0
libtpu: 0.0.40
codegen_flags: <defaults>
</compile_context>

<pallas_src>
import functools

import jax
import jax.numpy as jnp
from jax.experimental import pallas as pl
from jax.experimental.pallas import tpu as pltpu


def _bn_affine_kernel(x_ref, scale_ref, bias_ref, o_ref):
    # x_ref: (cb, lb); scale_ref/bias_ref: (cb, 1) f32 -> broadcast across the
    # lane (H*W) axis on the VPU inside the kernel (no extra HBM traffic).
    x = x_ref[...].astype(jnp.float32)
    o_ref[...] = (x * scale_ref[...] + bias_ref[...]).astype(o_ref.dtype)


def _tpu_vmem_capacity_bytes():
    """Physical VMEM capacity; conservative (v7x-sized) fallback."""
    try:
        return int(pltpu.get_tpu_info().vmem_capacity_bytes)
    except Exception:
        return 64 * 1024 * 1024


def _choose_blocks(rows, hw, itemsize, target_bytes):
    """Pick (row_block, lane_block) so one x/out buffer is ~target_bytes.

    * row_block is a multiple of the dtype's native sublane packing
      (8 for f32, 16 for bf16, 32 for int8/fp8) or the full row count.
    * lane_block is the full H*W whenever possible (lane-dense stores); only
      when one native row-group already exceeds the target do we tile H*W in
      multiples of 128 lanes.
    """
    sub = max(8, 32 // itemsize)           # native sublane multiple for dtype
    row_bytes = hw * itemsize

    if rows * row_bytes <= target_bytes:
        return rows, hw                     # whole array fits in one tile

    if sub * row_bytes <= target_bytes:
        cb = (target_bytes // row_bytes) // sub * sub
        cb = int(max(sub, min(rows, cb)))
        return cb, hw                       # tile rows only, full lane dim

    # A single native row-group is already > target: tile the lane dim too.
    cb = int(min(rows, sub))
    lb = (target_bytes // (cb * itemsize)) // 128 * 128
    lb = int(max(128, lb))
    if lb >= hw:
        lb = hw
    return cb, lb


@functools.partial(jax.jit, static_argnames=("eps",))
def batchnorm_conv_forward(x, gamma, beta, running_mean, running_var, *, eps=1e-5):
    """Forward of BatchNormConv on an NCHW input x."""
    N, C, H, W = x.shape
    HW = H * W
    NC = N * C
    itemsize = x.dtype.itemsize

    # Fold identity depthwise conv + eval-mode batchnorm into a per-channel
    # affine. Parameters kept in f32 regardless of x.dtype.
    inv_std = jax.lax.rsqrt(running_var.astype(jnp.float32) + jnp.float32(eps))
    scale_c = gamma.astype(jnp.float32) * inv_std                       # (C,)
    bias_c = beta.astype(jnp.float32) - running_mean.astype(jnp.float32) * scale_c

    # Flatten to a single long row axis; pre-broadcast params to (N*C, 1).
    x2 = x.reshape(NC, HW)
    scale2 = jnp.broadcast_to(scale_c[None, :], (N, C)).reshape(NC, 1)
    bias2 = jnp.broadcast_to(bias_c[None, :], (N, C)).reshape(NC, 1)

    # Generation-aware sizing: ~75% of physical VMEM as the Mosaic limit,
    # 4 MiB tiles (8 MiB when 128 MiB VMEM is available). 4 double-buffered
    # tiles + params stay comfortably under the limit in all cases.
    vmem_cap = _tpu_vmem_capacity_bytes()
    vmem_limit = int(vmem_cap * 3 // 4)
    target_bytes = (8 << 20) if vmem_cap >= (96 << 20) else (4 << 20)

    cb, lb = _choose_blocks(NC, HW, itemsize, target_bytes)
    grid = (pl.cdiv(NC, cb), pl.cdiv(HW, lb))

    cost = pl.CostEstimate(
        flops=2 * NC * HW,
        transcendentals=0,
        bytes_accessed=2 * NC * HW * itemsize + 2 * NC * 4,
    )

    out2 = pl.pallas_call(
        _bn_affine_kernel,
        out_shape=jax.ShapeDtypeStruct((NC, HW), x.dtype),
        grid=grid,
        in_specs=[
            pl.BlockSpec((cb, lb), lambda i, j: (i, j)),   # x tile
            pl.BlockSpec((cb, 1), lambda i, j: (i, 0)),    # scale (f32)
            pl.BlockSpec((cb, 1), lambda i, j: (i, 0)),    # bias  (f32)
        ],
        out_specs=pl.BlockSpec((cb, lb), lambda i, j: (i, j)),
        compiler_params=pltpu.CompilerParams(
            # Elementwise, fully independent tiles -> both axes parallel
            # (shards across both TensorCores on v7x).
            dimension_semantics=("parallel", "parallel"),
            vmem_limit_bytes=vmem_limit,
        ),
        cost_estimate=cost,
        # NOTE: no input_output_aliases -- only worthwhile if the caller truly
        # donates x at the jit boundary; otherwise XLA inserts a defensive copy.
    )(x2, scale2, bias2)

    return out2.reshape(N, C, H, W)


if __name__ == "__main__":
    key = jax.random.PRNGKey(0)
    k_x, k_g, k_b, k_m, k_v = jax.random.split(key, 5)

    N, C, H, W = 2, 4, 16, 16
    x = jax.random.normal(k_x, (N, C, H, W), dtype=jnp.float32)

    # Deterministic "trained" batchnorm statistics / affine params.
    gamma = jax.random.normal(k_g, (C,), dtype=jnp.float32) * 0.1 + 1.0
    beta = jax.random.normal(k_b, (C,), dtype=jnp.float32) * 0.1
    running_mean = jax.random.normal(k_m, (C,), dtype=jnp.float32) * 0.5
    running_var = jax.random.uniform(k_v, (C,), dtype=jnp.float32,
                                     minval=0.5, maxval=1.5)
    eps = 1e-5

    out = batchnorm_conv_forward(x, gamma, beta, running_mean, running_var,
                                 eps=eps)
    out = jax.block_until_ready(out)

    # Pure-JAX reference (eval-mode batchnorm applied per channel, NCHW).
    ref = (x - running_mean[None, :, None, None]) * jax.lax.rsqrt(
        running_var[None, :, None, None] + eps
    ) * gamma[None, :, None, None] + beta[None, :, None, None]

    assert out.shape == (N, C, H, W)
    assert jnp.allclose(out, ref, atol=1e-5, rtol=1e-5)

    print("KERNEL_OK")
</pallas_src>

<mosaic_0001>
module attributes {stable_mosaic.version = 11 : i64} {
  func.func @_bn_affine_kernel(%arg0: i32, %arg1: i32, %arg2: memref<8x256xf32, #tpu.memory_space<vmem>>, %arg3: memref<8x1xf32, #tpu.memory_space<vmem>>, %arg4: memref<8x1xf32, #tpu.memory_space<vmem>>, %arg5: memref<8x256xf32, #tpu.memory_space<vmem>>) attributes {dimension_semantics = [#tpu.dimension_semantics<parallel>, #tpu.dimension_semantics<parallel>], iteration_bounds = array<i64: 1, 1>, scalar_prefetch = 0 : i64, scratch_operands = 0 : i64, tpu.core_type = #tpu.core_type<tc>, window_params = [{transform_indices = @transform_0, window_bounds = array<i64: 8, 256>}, {transform_indices = @transform_1, window_bounds = array<i64: 8, 1>}, {transform_indices = @transform_2, window_bounds = array<i64: 8, 1>}, {transform_indices = @transform_3, window_bounds = array<i64: 8, 256>}]} {
    %c0 = arith.constant 0 : index
    %c0_0 = arith.constant 0 : index
    %0 = vector.load %arg2[%c0, %c0_0] : memref<8x256xf32, #tpu.memory_space<vmem>>, vector<8x256xf32>
    %c0_1 = arith.constant 0 : index
    %c0_2 = arith.constant 0 : index
    %1 = vector.load %arg3[%c0_1, %c0_2] : memref<8x1xf32, #tpu.memory_space<vmem>>, vector<8x1xf32>
    %2 = vector.broadcast %1 : vector<8x1xf32> to vector<8x256xf32>
    %3 = arith.mulf %0, %2 : vector<8x256xf32>
    %c0_3 = arith.constant 0 : index
    %c0_4 = arith.constant 0 : index
    %4 = vector.load %arg4[%c0_3, %c0_4] : memref<8x1xf32, #tpu.memory_space<vmem>>, vector<8x1xf32>
    %5 = vector.broadcast %4 : vector<8x1xf32> to vector<8x256xf32>
    %6 = arith.addf %3, %5 : vector<8x256xf32>
    %c0_5 = arith.constant 0 : index
    %c0_6 = arith.constant 0 : index
    %7 = vector.load %arg5[%c0_5, %c0_6] : memref<8x256xf32, #tpu.memory_space<vmem>>, vector<8x256xf32>
    tpu.vector_store %arg5[%c0_5, %c0_6], %6 {strides = array<i32>} : memref<8x256xf32, #tpu.memory_space<vmem>>, vector<8x256xf32>,
    return
  }
  func.func @transform_0(%arg0: i32, %arg1: i32) -> (i32, i32) {
    %c0_i32 = arith.constant 0 : i32
    return %arg0, %arg1 : i32, i32
  }
  func.func @transform_1(%arg0: i32, %arg1: i32) -> (i32, i32) {
    %c0_i32 = arith.constant 0 : i32
    %c0_i32_0 = arith.constant 0 : i32
    return %arg0, %c0_i32 : i32, i32
  }
  func.func @transform_2(%arg0: i32, %arg1: i32) -> (i32, i32) {
    %c0_i32 = arith.constant 0 : i32
    %c0_i32_0 = arith.constant 0 : i32
    return %arg0, %c0_i32 : i32, i32
  }
  func.func @transform_3(%arg0: i32, %arg1: i32) -> (i32, i32) {
    %c0_i32 = arith.constant 0 : i32
    return %arg0, %arg1 : i32, i32
  }
}

</mosaic_0001>

<bundles_post_ra>
// kernel: batchnorm_conv_forward.1
= control target key start
LH: loop header
LB: loop body
LE: loop exit
PB: predicated region body
PF: predicated region fallthrough
CT: control target
= control target key end

     0   :  { %v40_v0 = vmov 0   ;;  %s79_s1 = inlined_call_operand.vmem [shape: f32[8,1], index: 1, kind: input, shape index: {}]   ;;  %s80_s2 = inlined_call_operand.vmem [shape: f32[8,1], index: 2, kind: input, shape index: {}]   ;;  %s81_s0 = inlined_call_operand.vmem [shape: f32[8,256], index: 0, kind: input, shape index: {}]   ;;  %s82_s3 = inlined_call_operand.vmem [shape: f32[8,256], index: 3, kind: output, shape index: {}]  }
   0x1   :  { %39 = vset.pattern.permute.xlu0 %v40_v0  ;;  %v16_v1 = vld [vmem:[%s79_s1] sm:$0xff]  ;;  %v15_v5 = vld [vmem:[%s81_s0 + $0x8] sm:$0xff] }
   0x2   :  { %19 = vperm.xlu0 %39, %v16_v1   ;;  %v24_v2 = vld [vmem:[%s80_s2] sm:$0xff] }
   0x3   :  { %v14_v4 = vld [vmem:[%s81_s0] sm:$0xff] }
   0xa   :  { %27 = vperm.xlu0 %39, %v24_v2  }
  0x74   :  { %v20_v3 = vpop.permute.xlu0 %19 }
  0x75   :  { %v22_v6 = vmul.f32 %v20_v3, %v14_v4  ;;  %v23_v7 = vmul.f32 %v20_v3, %v15_v5 }
  0x7c   :  { %v28_v8 = vpop.permute.xlu0 %27 }
  0x7d   :  { %v30_v9 = vadd.f32 %v28_v8, %v22_v6  ;;  %v31_v10 = vadd.f32 %v28_v8, %v23_v7 }
  0x7f   :  { %32 = vst [vmem:[%s82_s3] sm:$0xff] %v30_v9 }
  0x80   :  { %33 = vst [vmem:[%s82_s3 + $0x8] sm:$0xff] %v31_v10 }

</bundles_post_ra>
